<compile_context>
chip_gen: v5e
topology: v5e:2x2
jax: 0.10.0
libtpu: 0.0.40
codegen_flags: <defaults>
</compile_context>

<pallas_src>
import functools

import jax
import jax.numpy as jnp
import numpy as np
from jax.experimental import pallas as pl
from jax.experimental.pallas import tpu as pltpu

NEG_SLOPE = 0.01  # nn.LeakyReLU default negative_slope


def _round_up(x, m):
    return ((x + m - 1) // m) * m


def _vmem_capacity_bytes():
    """Physical VMEM bytes of the attached TPU (conservative fallback: 64 MiB)."""
    try:
        return int(pltpu.get_tpu_info().vmem_capacity_bytes)
    except Exception:
        return 64 * 1024 * 1024  # v7x-sized: the safest assumption


# ----------------------------- Pallas kernel -----------------------------

def _fc_kernel(x_ref, w_ref, b_ref, o_ref, acc_ref, *, negative_slope):
    # grid = (M//tm, N//tn, K//tk); K is the innermost ("arbitrary") reduction.
    k = pl.program_id(2)

    @pl.when(k == 0)
    def _():
        acc_ref[...] = jnp.zeros_like(acc_ref)

    # bf16 x bf16 -> f32 accumulate on the MXU.
    acc_ref[...] += jnp.dot(x_ref[...], w_ref[...],
                            preferred_element_type=jnp.float32)

    @pl.when(k == pl.num_programs(2) - 1)
    def _():
        y = acc_ref[...] + b_ref[...]            # f32 bias add, broadcast over rows
        o_ref[...] = jnp.where(y >= 0, y, negative_slope * y).astype(o_ref.dtype)


# ----------------------------- module wrapper -----------------------------

class FullyConnectedPallas:
    """y = LeakyReLU(x @ W.T + b), W in PyTorch (out_features, in_features) layout.

    Weight transpose / padding / bf16 cast is done ONCE at construction; the
    per-call path only pads the activation along K (zeros, required for the
    reduction) and M (to a tile multiple).
    """

    def __init__(self, weight, bias, *, negative_slope=NEG_SLOPE,
                 compute_dtype=jnp.bfloat16, out_dtype=jnp.float32,
                 tm=None, tn=None, tk=None, input_buffer_count=None):
        weight = jnp.asarray(weight)
        bias = jnp.asarray(bias)
        N, K = weight.shape
        self.N, self.K = int(N), int(K)
        self.negative_slope = float(negative_slope)
        self.compute_dtype = compute_dtype
        self.out_dtype = out_dtype
        self.input_buffer_count = input_buffer_count  # pl.Buffered depth sweep knob

        # Generation-aware tile budget: big tiles on v5e/v6e (128 MiB VMEM),
        # moderate 256-aligned tiles on v7x (64 MiB VMEM).
        self.phys_vmem = _vmem_capacity_bytes()
        big_vmem = self.phys_vmem >= 96 * 1024 * 1024
        if tm is None:
            tm = 1536 if big_vmem else 1024
        if tn is None:
            tn = 1536 if big_vmem else 1024
        if tk is None:
            tk = 512

        Kp = _round_up(max(self.K, 128), 128)
        Np = _round_up(max(self.N, 128), 128)
        tk = min(tk, Kp)
        tn = min(tn, Np)
        Kp = _round_up(Kp, tk)
        Np = _round_up(Np, tn)
        self.tm, self.tn, self.tk = tm, tn, tk
        self.Kp, self.Np = Kp, Np

        # One-time parameter prep: (N, K) -> (Kp, Np) in compute_dtype so the
        # GEMM output is lane-dense along N; bias stays f32 for the epilogue.
        wt = weight.T.astype(compute_dtype)                       # (K, N)
        if (Kp, Np) != (self.K, self.N):
            wt = jnp.pad(wt, ((0, Kp - self.K), (0, Np - self.N)))
        self.wp = wt
        b2 = bias.astype(jnp.float32).reshape(1, self.N)
        if Np != self.N:
            b2 = jnp.pad(b2, ((0, 0), (0, Np - self.N)))
        self.bp = b2

    def __call__(self, x):
        *lead, K = x.shape
        assert K == self.K, f"expected last dim {self.K}, got {K}"
        M = int(np.prod(lead)) if lead else 1
        x2 = x.reshape(M, K).astype(self.compute_dtype)

        tm, tn, tk = self.tm, self.tn, self.tk
        Kp, Np = self.Kp, self.Np

        Mp = _round_up(max(M, 8), 8)
        tm = min(tm, Mp)
        Mp = _round_up(Mp, tm)

        # Small-M (decode-style) shapes: keep at least two parallel output
        # tiles so v7x's second TensorCore has work (harmless on 1-TC chips,
        # since activation re-streaming at small M is negligible).
        if Mp // tm == 1 and Np // tn < 2 and Np >= 512 and Np % 512 == 0:
            tn = Np // 2

        # Only pad the activation where required: K must be zero-padded for
        # the reduction; M is padded to the tile multiple (rows sliced off).
        if (Mp, Kp) != (M, K):
            x2 = jnp.pad(x2, ((0, Mp - M), (0, Kp - K)))

        grid = (Mp // tm, Np // tn, Kp // tk)

        cd = jnp.dtype(self.compute_dtype).itemsize
        ob = jnp.dtype(self.out_dtype).itemsize
        # double-buffered input/output tiles + f32 accumulator + bias row
        vmem_bytes = (2 * (tm * tk + tk * tn) * cd
                      + 2 * tm * tn * ob
                      + tm * tn * 4
                      + 2 * tn * 4)
        vmem_limit = int(min(max(vmem_bytes * 1.5, 32 * 1024 * 1024),
                             self.phys_vmem * 3 // 4))
        vmem_limit = max(vmem_limit, int(vmem_bytes * 1.25))

        if self.input_buffer_count is not None:
            x_spec = pl.BlockSpec((tm, tk), lambda i, j, k: (i, k),
                                  pipeline_mode=pl.Buffered(self.input_buffer_count))
            w_spec = pl.BlockSpec((tk, tn), lambda i, j, k: (k, j),
                                  pipeline_mode=pl.Buffered(self.input_buffer_count))
        else:
            x_spec = pl.BlockSpec((tm, tk), lambda i, j, k: (i, k))
            w_spec = pl.BlockSpec((tk, tn), lambda i, j, k: (k, j))
        # Bias block index only depends on j, so the pipeline skips re-DMA
        # across the K axis.
        b_spec = pl.BlockSpec((1, tn), lambda i, j, k: (0, j))

        out_p = pl.pallas_call(
            functools.partial(_fc_kernel, negative_slope=self.negative_slope),
            out_shape=jax.ShapeDtypeStruct((Mp, Np), self.out_dtype),
            grid_spec=pltpu.PrefetchScalarGridSpec(
                num_scalar_prefetch=0,
                grid=grid,
                in_specs=[x_spec, w_spec, b_spec],
                out_specs=pl.BlockSpec((tm, tn), lambda i, j, k: (i, j)),
                scratch_shapes=[pltpu.VMEM((tm, tn), jnp.float32)],
            ),
            compiler_params=pltpu.CompilerParams(
                dimension_semantics=("parallel", "parallel", "arbitrary"),
                vmem_limit_bytes=vmem_limit,
            ),
            cost_estimate=pl.CostEstimate(
                flops=2 * Mp * Np * Kp,
                transcendentals=0,
                bytes_accessed=cd * (Mp * Kp * (Np // tn) + Kp * Np * (Mp // tm))
                               + ob * Mp * Np,
            ),
        )(x2, self.wp, self.bp)

        out = out_p[:M, :self.N]
        return out.reshape(*lead, self.N) if lead else out.reshape(self.N)


def fully_connected_forward(x, weight, bias, **kwargs):
    """One-shot convenience wrapper (prefer constructing FullyConnectedPallas
    once and reusing it so the weight transform is not paid per call)."""
    return FullyConnectedPallas(weight, bias, **kwargs)(x)


# ----------------------------- reference (pure JAX) -----------------------------

def fully_connected_reference(x, weight, bias, *, negative_slope=NEG_SLOPE):
    y = jnp.einsum('...k,nk->...n', x, weight,
                   precision=jax.lax.Precision.HIGHEST) + bias
    return jnp.where(y >= 0, y, negative_slope * y)


# ----------------------------- main -----------------------------

if __name__ == "__main__":
    # Small shapes consistent with the module: Linear applied on the last dim.
    batch, seq, in_features, out_features = 2, 8, 32, 64

    key = jax.random.PRNGKey(0)
    kx, kw, kb = jax.random.split(key, 3)

    def _bf16_exact(a):
        # Make test values exactly bf16-representable so the bf16-operand
        # kernel and the f32 reference agree to f32-accumulation rounding.
        return a.astype(jnp.bfloat16).astype(jnp.float32)

    x = _bf16_exact(jax.random.normal(kx, (batch, seq, in_features), jnp.float32))
    bound = 1.0 / np.sqrt(in_features)
    weight = _bf16_exact(jax.random.uniform(
        kw, (out_features, in_features), jnp.float32, -bound, bound))
    bias = _bf16_exact(jax.random.uniform(
        kb, (out_features,), jnp.float32, -bound, bound))

    # Construct once (weight transpose/pad/bf16 cast hoisted), call the kernel.
    fc = FullyConnectedPallas(weight, bias)
    out = fc(x)
    out = jax.block_until_ready(out)

    ref = fully_connected_reference(x, weight, bias)
    assert out.shape == (batch, seq, out_features)
    np.testing.assert_allclose(np.asarray(out), np.asarray(ref),
                               rtol=1e-4, atol=1e-4)
    print("KERNEL_OK")
</pallas_src>

<mosaic_0001>
module attributes {stable_mosaic.version = 11 : i64} {
  func.func @_fc_kernel(%arg0: i32, %arg1: i32, %arg2: i32, %arg3: memref<16x128xbf16, #tpu.memory_space<vmem>>, %arg4: memref<128x128xbf16, #tpu.memory_space<vmem>>, %arg5: memref<1x128xf32, #tpu.memory_space<vmem>>, %arg6: memref<16x128xf32, #tpu.memory_space<vmem>>, %arg7: memref<16x128xf32, #tpu.memory_space<vmem>>) attributes {dimension_semantics = [#tpu.dimension_semantics<parallel>, #tpu.dimension_semantics<parallel>, #tpu.dimension_semantics<arbitrary>], iteration_bounds = array<i64: 1, 1, 1>, scalar_prefetch = 0 : i64, scratch_operands = 1 : i64, tpu.core_type = #tpu.core_type<tc>, window_params = [{transform_indices = @transform_0, window_bounds = array<i64: 16, 128>}, {transform_indices = @transform_1, window_bounds = array<i64: 128, 128>}, {transform_indices = @transform_2, window_bounds = array<i64: 1, 128>}, {transform_indices = @transform_3, window_bounds = array<i64: 16, 128>}]} {
    %c0_i32 = arith.constant 0 : i32
    %0 = arith.cmpi eq, %arg2, %c0_i32 : i32
    %1 = arith.extui %0 : i1 to i32
    %c0_i32_0 = arith.constant 0 : i32
    %2 = arith.cmpi ne, %1, %c0_i32_0 : i32
    scf.if %2 {
      %cst_10 = arith.constant 0.000000e+00 : f32
      %12 = vector.broadcast %cst_10 : f32 to vector<16x128xf32>
      %c0_11 = arith.constant 0 : index
      %c0_12 = arith.constant 0 : index
      %13 = vector.load %arg7[%c0_11, %c0_12] : memref<16x128xf32, #tpu.memory_space<vmem>>, vector<16x128xf32>
      tpu.vector_store %arg7[%c0_11, %c0_12], %12 {strides = array<i32>} : memref<16x128xf32, #tpu.memory_space<vmem>>, vector<16x128xf32>,
    } else {
    }
    %c0 = arith.constant 0 : index
    %c0_1 = arith.constant 0 : index
    %3 = vector.load %arg7[%c0, %c0_1] : memref<16x128xf32, #tpu.memory_space<vmem>>, vector<16x128xf32>
    %c0_2 = arith.constant 0 : index
    %c0_3 = arith.constant 0 : index
    %4 = vector.load %arg3[%c0_2, %c0_3] : memref<16x128xbf16, #tpu.memory_space<vmem>>, vector<16x128xbf16>
    %c0_4 = arith.constant 0 : index
    %c0_5 = arith.constant 0 : index
    %5 = vector.load %arg4[%c0_4, %c0_5] : memref<128x128xbf16, #tpu.memory_space<vmem>>, vector<128x128xbf16>
    %cst = arith.constant dense<0.000000e+00> : vector<16x128xf32>
    %6 = tpu.matmul %4, %5, %cst {dimension_numbers = #tpu.dot_dimension_numbers<[1], [0], [0], [1], [0, 0, 1, 1], [], []>} : vector<16x128xbf16>, vector<128x128xbf16>, vector<16x128xf32> -> vector<16x128xf32>
    %7 = arith.addf %3, %6 : vector<16x128xf32>
    %c0_6 = arith.constant 0 : index
    %c0_7 = arith.constant 0 : index
    %8 = vector.load %arg7[%c0_6, %c0_7] : memref<16x128xf32, #tpu.memory_space<vmem>>, vector<16x128xf32>
    tpu.vector_store %arg7[%c0_6, %c0_7], %7 {strides = array<i32>} : memref<16x128xf32, #tpu.memory_space<vmem>>, vector<16x128xf32>,
    %c0_i32_8 = arith.constant 0 : i32
    %9 = arith.cmpi eq, %arg2, %c0_i32_8 : i32
    %10 = arith.extui %9 : i1 to i32
    %c0_i32_9 = arith.constant 0 : i32
    %11 = arith.cmpi ne, %10, %c0_i32_9 : i32
    scf.if %11 {
      %c0_10 = arith.constant 0 : index
      %c0_11 = arith.constant 0 : index
      %12 = vector.load %arg7[%c0_10, %c0_11] : memref<16x128xf32, #tpu.memory_space<vmem>>, vector<16x128xf32>
      %c0_12 = arith.constant 0 : index
      %c0_13 = arith.constant 0 : index
      %13 = vector.load %arg5[%c0_12, %c0_13] : memref<1x128xf32, #tpu.memory_space<vmem>>, vector<1x128xf32>
      %14 = vector.broadcast %13 : vector<1x128xf32> to vector<16x128xf32>
      %15 = arith.addf %12, %14 : vector<16x128xf32>
      %cst_14 = arith.constant 0.000000e+00 : f32
      %16 = vector.broadcast %cst_14 : f32 to vector<16x128xf32>
      %17 = arith.cmpf oge, %15, %16 : vector<16x128xf32>
      %cst_15 = arith.constant 0.00999999977 : f32
      %18 = vector.broadcast %cst_15 : f32 to vector<16x128xf32>
      %19 = arith.mulf %18, %15 : vector<16x128xf32>
      %20 = arith.select %17, %15, %19 : vector<16x128xi1>, vector<16x128xf32>
      %c0_16 = arith.constant 0 : index
      %c0_17 = arith.constant 0 : index
      %21 = vector.load %arg6[%c0_16, %c0_17] : memref<16x128xf32, #tpu.memory_space<vmem>>, vector<16x128xf32>
      tpu.vector_store %arg6[%c0_16, %c0_17], %20 {strides = array<i32>} : memref<16x128xf32, #tpu.memory_space<vmem>>, vector<16x128xf32>,
    } else {
    }
    return
  }
  func.func @transform_0(%arg0: i32, %arg1: i32, %arg2: i32) -> (i32, i32) {
    %c0_i32 = arith.constant 0 : i32
    return %arg0, %arg2 : i32, i32
  }
  func.func @transform_1(%arg0: i32, %arg1: i32, %arg2: i32) -> (i32, i32) {
    %c0_i32 = arith.constant 0 : i32
    return %arg2, %arg1 : i32, i32
  }
  func.func @transform_2(%arg0: i32, %arg1: i32, %arg2: i32) -> (i32, i32) {
    %c0_i32 = arith.constant 0 : i32
    %c0_i32_0 = arith.constant 0 : i32
    return %c0_i32, %arg1 : i32, i32
  }
  func.func @transform_3(%arg0: i32, %arg1: i32, %arg2: i32) -> (i32, i32) {
    %c0_i32 = arith.constant 0 : i32
    return %arg0, %arg1 : i32, i32
  }
}

</mosaic_0001>

<bundles_post_ra>
// kernel: tpu_custom_call.1
= control target key start
LH: loop header
LB: loop body
LE: loop exit
PB: predicated region body
PF: predicated region fallthrough
CT: control target
= control target key end

     0   :  { %8 = vsyncpa [#allocation4], 0  ;;  %s354_s0 = inlined_call_operand.hbm [shape: bf16[16,128], index: 0, kind: input, shape index: {}]   ;;  %s355_s1 = inlined_call_operand.hbm [shape: bf16[128,128], index: 1, kind: input, shape index: {}]   ;;  %s356_s2 = inlined_call_operand.vmem [shape: f32[1,128], index: 2, kind: input, shape index: {}]   ;;  %s357_s3 = inlined_call_operand.hbm [shape: f32[16,128], index: 3, kind: output, shape index: {}]  }
   0x1   :  { %9 = vsyncpa [#allocation7], 0 }
   0x2   :  { %10 = vsyncpa [#allocation5], 0  ;;  %s15_s14 = sshll.u32 %s354_s0, 4  ;;  %s315_s15 = smov [#allocation3]   ;;  %s16_s14 = int_to_ptr.hbm [resolvable:$true] %s15_s14 }
   0x3   :  { %s17_s16 = sshll.u32 %s315_s15, 4  ;;  %s28_s19 = sshll.u32 %s355_s1, 4  ;;  %s18_s16 = int_to_ptr.vmem [resolvable:$true] %s17_s16  ;;  %s29_s19 = int_to_ptr.hbm [resolvable:$true] %s28_s19 }
   0x4   :  { %s316_s20 = smov 64   ;;  %s317_s21 = smov 4  }
   0x5   :  { %23 = dma.hbm_to_vmem [thread:$0]  %s16_s14, 128, %s18_s16, [#allocation4], %s316_s20, %s316_s20, %s317_s21  }
   0x6   :  { %s318_s22 = smov [#allocation6]  }
   0x7   :  { %s30_s23 = sshll.u32 %s318_s22, 4  ;;  %s31_s23 = int_to_ptr.vmem [resolvable:$true] %s30_s23 }
   0x8   :  { %36 = dma.hbm_to_vmem [thread:$0]  %s29_s19, 1024, %s31_s23, [#allocation7], %s316_s20, %s316_s20, %s317_s21  }
   0x9   :  { %309 = dma.done.wait [#allocation4], 128  }
   0xa   :  { %310 = vsyncadd [#allocation4], 4294967168 }
   0xb   :  { %311 = dma.done.wait [#allocation7], 1024  }
   0xc   :  { %312 = vsyncadd [#allocation7], 4294966272  ;;  %v228_v0 = vld [vmem:[#allocation6 + $0x38] sm:$0xff]  ;;  %v227_v1 = vld [vmem:[#allocation6 + $0x30] sm:$0xff]  ;;  %s319_s24 = smov [#allocation8]   ;;  %s170_s28 = sshll.u32 %s357_s3, 4  ;;  %s171_s28 = int_to_ptr.hbm [resolvable:$true] %s170_s28 }
   0xd   :  { %127 = vmatpush.bf16.msra.mxu0 %v228_v0  ;;  %v226_v2 = vld [vmem:[#allocation6 + $0x28] sm:$0xff]  ;;  %v225_v3 = vld [vmem:[#allocation6 + $0x20] sm:$0xff]  ;;  %v224_v4 = vld [vmem:[#allocation6 + $0x18] sm:$0xff]  ;;  %s168_s25 = sshll.u32 %s319_s24, 4  ;;  %s321_s29 = smov 8   ;;  %s169_s25 = int_to_ptr.vmem [resolvable:$true] %s168_s25 }
   0xe   :  { %v223_v5 = vld [vmem:[#allocation6 + $0x10] sm:$0xff]  ;;  %v222_v6 = vld [vmem:[#allocation6 + $0x8] sm:$0xff]  ;;  %v221_v7 = vld [vmem:[#allocation6] sm:$0xff] }
   0xf   :  { %v220_v8 = vld [vmem:[#allocation3] sm:$0xff] }
  0x10   :  { %v236_v9 = vld [vmem:[%s356_s2] ss:$0 sm:$0xff]  ;;  %s320_s2 = smov 128  }
  0x11   :  { %128 = vmatpush.bf16.msra.mxu0 %v227_v1 }
  0x15   :  { %129 = vmatpush.bf16.msra.mxu0 %v226_v2 }
  0x19   :  { %130 = vmatpush.bf16.msra.mxu0 %v225_v3 }
  0x1d   :  { %131 = vmatpush.bf16.msra.mxu0 %v224_v4 }
  0x21   :  { %132 = vmatpush.bf16.msra.mxu0 %v223_v5 }
  0x25   :  { %133 = vmatpush.bf16.msra.mxu0 %v222_v6 }
  0x29   :  { %134 = vmatpush.bf16.msra.mxu0 %v221_v7 }
  0x2c   :  { %135 = vmatmul.bf16.vlgmr.msra.gmra.mxu0 %v220_v8 }
  0xa9   :  { %v136_v10 = vpop.f32.mrf.mxu0 }
  0xaa   :  { %v154_v11 = vadd.f32 %v236_v9, %v136_v10 }
  0xac   :  { %vm156_vm0 = vcmp.ge.f32.partialorder %v154_v11, 0.0  ;;  %v158_v12 = vmul.f32 0.01, %v154_v11 }
  0xae   :  { %v160_v13 = vsel %vm156_vm0, %v154_v11, %v158_v12 }
  0xaf   :  { %162 = vst [vmem:[#allocation8] sm:$0xff] %v160_v13 }
  0xb1   :  { %v138_v14 = vpop.f32.mrf.mxu0 }
  0xb2   :  { %v155_v15 = vadd.f32 %v236_v9, %v138_v14 }
  0xb4   :  { %vm157_vm1 = vcmp.ge.f32.partialorder %v155_v15, 0.0  ;;  %v159_v16 = vmul.f32 0.01, %v155_v15 }
  0xb6   :  { %v161_v17 = vsel %vm157_vm1, %v155_v15, %v159_v16 }
  0xb7   :  { %163 = vst [vmem:[#allocation8 + $0x8] sm:$0xff] %v161_v17 }
  0xb8   :  { %176 = dma.vmem_to_hbm [thread:$0]  %s169_s25, 256, %s171_s28, [#allocation5], %s320_s2, %s320_s2, %s321_s29  }
  0xb9   :  { %313 = dma.done.wait [#allocation5], 256  }
  0xba   :  { %314 = vsyncadd [#allocation5], 4294967040 }
  0xbb   :  { %181 = vsyncpa [#allocation4], 1 }
  0xbc   :  { %182 = vsyncpa [#allocation7], 1 }
  0xbd   :  { %183 = vsyncpa [#allocation5], 1 }

</bundles_post_ra>
